<compile_context>
chip_gen: v6e
topology: v6e:2x2x1
jax: 0.10.0
libtpu: 0.0.40
codegen_flags: <defaults>
</compile_context>

<pallas_src>
import functools
import math
import re

import jax
import jax.numpy as jnp
from jax.experimental import pallas as pl
from jax.experimental.pallas import tpu as pltpu

_LANE = 128
# Minimum sublane tile per dtype byte-width (f32: 8, bf16/f16: 16, int8/fp8: 32).
_SUB_MULT = {4: 8, 2: 16, 1: 32}


def _smelu_kernel(x_ref, o_ref, *, beta: float, inv_4beta: float, compute_dtype):
    x = x_ref[...].astype(compute_dtype)
    xb = x + beta
    quad = xb * xb * inv_4beta
    # Equivalent to: where(|x| <= beta, quad, where(x >= beta, x, 0))
    # (values agree at both boundaries x = +/-beta). NaN/garbage-safe on the
    # masked rows of a partial last block (only cmp/select/mul/add).
    out = jnp.where(x >= beta, x, jnp.where(x <= -beta, 0.0, quad))
    o_ref[...] = out.astype(o_ref.dtype)


def _tpu_generation() -> int:
    """Best-effort TPU generation from device_kind ('TPU v5e' -> 5, 'TPU7x' -> 7)."""
    try:
        kind = jax.devices()[0].device_kind
    except Exception:
        return 0
    m = re.search(r"(\d+)", kind)
    return int(m.group(1)) if m else 0


def _chip_config(gen: int):
    """(target_block_bytes, min_blocks, vmem_cap_bytes) per generation."""
    if gen >= 7:
        # 2 TensorCores, 64 MiB VMEM/TC, ~3.2 TB/s HBM: bigger blocks amortize the
        # ~0.35us step overhead; >=4 blocks keeps both cores pipelined.
        return 8 << 20, 4, 48 << 20
    if gen == 6:
        # Single TC, 128 MiB physical VMEM: large block, no forced split.
        return 8 << 20, 1, 64 << 20
    # v5e / unknown: conservative 4 MiB blocks, f32-friendly.
    return 4 << 20, 1, 64 << 20


def _pick_lanes(n: int, sub_mult: int) -> int:
    """Widest lane count (multiple of 128) dividing n with >= one sublane tile of rows."""
    lanes = _LANE
    for cand in (256, 512, 1024, 2048, 4096, 8192):
        if n % cand == 0 and n // cand >= sub_mult:
            lanes = cand
    return lanes


def _choose_tile_rows(rows, width_padded, itemsize, sub_mult, target_block_bytes,
                      min_blocks):
    bytes_per_row = width_padded * itemsize
    t = max(sub_mult, (target_block_bytes // max(bytes_per_row, 1)) // sub_mult * sub_mult)
    tile_rows = rows if t >= rows else t  # full dim or a multiple of sub_mult
    # Multi-TensorCore chips (v7x): ensure >= min_blocks (>=2 per core) so the
    # next input DMA overlaps the current output writeback on each core.
    if min_blocks > 1 and rows >= min_blocks * sub_mult:
        cap = max(sub_mult, (rows // min_blocks) // sub_mult * sub_mult)
        tile_rows = min(tile_rows, cap)
    return tile_rows


def _launch(x2d, tile_rows, *, beta, compute_dtype, sub_mult, vmem_cap,
            n_elems, itemsize, donate):
    rows, width = x2d.shape
    # VMEM footprint of one block (lane/sublane padded), x4 for double-buffered
    # input + output, plus headroom for compiler-internal scratch.
    width_padded = ((width + _LANE - 1) // _LANE) * _LANE
    tile_rows_padded = ((min(tile_rows, rows) + sub_mult - 1) // sub_mult) * sub_mult
    block_vmem = tile_rows_padded * width_padded * itemsize
    vmem_limit = int(min(vmem_cap, max(32 << 20, 4 * block_vmem + (8 << 20))))

    kernel = functools.partial(
        _smelu_kernel,
        beta=float(beta),
        inv_4beta=1.0 / (4.0 * float(beta)),
        compute_dtype=compute_dtype,
    )

    return pl.pallas_call(
        kernel,
        out_shape=jax.ShapeDtypeStruct((rows, width), x2d.dtype),
        grid_spec=pltpu.PrefetchScalarGridSpec(
            num_scalar_prefetch=0,
            grid=(pl.cdiv(rows, tile_rows),),
            in_specs=[pl.BlockSpec((tile_rows, width), lambda i: (i, 0))],
            out_specs=pl.BlockSpec((tile_rows, width), lambda i: (i, 0)),
        ),
        compiler_params=pltpu.CompilerParams(
            dimension_semantics=("parallel",),
            vmem_limit_bytes=vmem_limit,
        ),
        cost_estimate=pl.CostEstimate(
            flops=7 * n_elems,
            transcendentals=0,
            bytes_accessed=2 * n_elems * itemsize,
        ),
        input_output_aliases=({0: 0} if donate else {}),
    )(x2d)


def smelu(x: jax.Array, beta: float = 2.0, *, donate_input: bool = False) -> jax.Array:
    """Elementwise SmeLU. Accepts any shape; computed on a lane-dense 2D slab."""
    orig_shape = x.shape
    dtype = x.dtype
    itemsize = jnp.dtype(dtype).itemsize
    sub_mult = _SUB_MULT.get(itemsize, 8)
    n = math.prod(orig_shape)

    if x.ndim == 0 or n == 0:
        # Degenerate sizes: no useful tiling; same formula in plain jnp.
        relu = jnp.where(x >= beta, x, jnp.zeros_like(x))
        return jnp.where(jnp.abs(x) <= beta,
                         ((x + beta) ** 2) / (4.0 * beta), relu).astype(dtype)

    gen = _tpu_generation()
    target_block_bytes, min_blocks, vmem_cap = _chip_config(gen)

    # Native bf16 math on chips with a bf16 VPU (v6e/v7x); f32 elsewhere.
    if dtype == jnp.bfloat16 and gen >= 6:
        compute_dtype = jnp.bfloat16
    else:
        compute_dtype = jnp.float32

    if n % _LANE == 0:
        # Fast path: lane-dense 2D slab (free reshape, fully contiguous blocks).
        lanes = _pick_lanes(n, sub_mult)
        rows = n // lanes
        x2d = x.reshape(rows, lanes)
        tile_rows = _choose_tile_rows(rows, lanes, itemsize, sub_mult,
                                      target_block_bytes, min_blocks)
        out2d = _launch(x2d, tile_rows, beta=beta, compute_dtype=compute_dtype,
                        sub_mult=sub_mult, vmem_cap=vmem_cap, n_elems=n,
                        itemsize=itemsize, donate=donate_input)
        return out2d.reshape(orig_shape)

    # Ragged numel: no 128-divisible flattening exists without a copy, so keep
    # the full last dim as the lane axis (block last dim == full array dim is
    # legal) and tile the collapsed leading dims.  The cdiv grid's partial last
    # block is masked by Pallas.  HBM traffic stays 1x (no pad / slice copies).
    last = orig_shape[-1]
    rows = n // last
    lane_padded = ((last + _LANE - 1) // _LANE) * _LANE
    if lane_padded * itemsize * sub_mult * 4 + (8 << 20) > vmem_cap:
        # TODO(synk): pathological huge ragged last dim -- pad+slice fallback
        # (extra copies); never hit by conv-style activation shapes.
        flat = jnp.pad(x.reshape(-1), (0, (-n) % _LANE))
        return smelu(flat, beta)[:n].reshape(orig_shape)
    x2d = x.reshape(rows, last)
    tile_rows = _choose_tile_rows(rows, lane_padded, itemsize, sub_mult,
                                  target_block_bytes, min_blocks)
    out2d = _launch(x2d, tile_rows, beta=beta, compute_dtype=compute_dtype,
                    sub_mult=sub_mult, vmem_cap=vmem_cap, n_elems=n,
                    itemsize=itemsize, donate=donate_input)
    return out2d.reshape(orig_shape)


def smelu_ref(x: jax.Array, beta: float = 2.0) -> jax.Array:
    relu = jnp.where(x >= beta, x, jnp.zeros_like(x))
    return jnp.where(jnp.abs(x) <= beta, ((x + beta) ** 2) / (4.0 * beta), relu)


if __name__ == "__main__":
    key = jax.random.PRNGKey(0)
    k0, k1, k2, k3 = jax.random.split(key, 4)

    cases = [
        # Primary NCHW activation shape.
        jax.random.normal(k0, (2, 4, 16, 16), dtype=jnp.float32) * 3.0,
        # Multi-block / forced-split path on v7x.
        jax.random.normal(k1, (2, 4, 56, 56), dtype=jnp.float32) * 3.0,
        # Ragged numel (not a multiple of 128): no-pad last-dim path.
        jax.random.normal(k2, (3, 5, 7, 11), dtype=jnp.float32) * 3.0,
        # bf16 input: native bf16 math on v6e/v7x, f32 upcast elsewhere.
        (jax.random.normal(k3, (2, 4, 16, 16), dtype=jnp.float32) * 3.0
         ).astype(jnp.bfloat16),
    ]

    ok = True
    for x in cases:
        out = jax.block_until_ready(smelu(x, beta=2.0))
        ref = smelu_ref(x.astype(jnp.float32), beta=2.0)
        tol = 3e-2 if x.dtype == jnp.bfloat16 else 1e-6
        ok &= out.shape == x.shape and out.dtype == x.dtype
        ok &= bool(jnp.allclose(out.astype(jnp.float32), ref, atol=tol, rtol=tol))

    assert ok, "mismatch vs reference"
    print("KERNEL_OK")
</pallas_src>

<mosaic_0001>
module attributes {stable_mosaic.version = 11 : i64} {
  func.func @_smelu_kernel(%arg0: i32, %arg1: memref<8x256xf32, #tpu.memory_space<vmem>>, %arg2: memref<8x256xf32, #tpu.memory_space<vmem>>) attributes {dimension_semantics = [#tpu.dimension_semantics<parallel>], iteration_bounds = array<i64: 1>, scalar_prefetch = 0 : i64, scratch_operands = 0 : i64, tpu.core_type = #tpu.core_type<tc>, window_params = [{transform_indices = @transform_0, window_bounds = array<i64: 8, 256>}, {transform_indices = @transform_1, window_bounds = array<i64: 8, 256>}]} {
    %c0 = arith.constant 0 : index
    %c0_0 = arith.constant 0 : index
    %0 = vector.load %arg1[%c0, %c0_0] : memref<8x256xf32, #tpu.memory_space<vmem>>, vector<8x256xf32>
    %cst = arith.constant 2.000000e+00 : f32
    %1 = vector.broadcast %cst : f32 to vector<8x256xf32>
    %2 = arith.addf %0, %1 : vector<8x256xf32>
    %3 = arith.mulf %2, %2 : vector<8x256xf32>
    %cst_1 = arith.constant 1.250000e-01 : f32
    %4 = vector.broadcast %cst_1 : f32 to vector<8x256xf32>
    %5 = arith.mulf %3, %4 : vector<8x256xf32>
    %cst_2 = arith.constant 2.000000e+00 : f32
    %6 = vector.broadcast %cst_2 : f32 to vector<8x256xf32>
    %7 = arith.cmpf oge, %0, %6 : vector<8x256xf32>
    %cst_3 = arith.constant -2.000000e+00 : f32
    %8 = vector.broadcast %cst_3 : f32 to vector<8x256xf32>
    %9 = arith.cmpf ole, %0, %8 : vector<8x256xf32>
    %cst_4 = arith.constant 0.000000e+00 : f32
    %10 = vector.broadcast %cst_4 : f32 to vector<8x256xf32>
    %11 = arith.select %9, %10, %5 : vector<8x256xi1>, vector<8x256xf32>
    %12 = arith.select %7, %0, %11 : vector<8x256xi1>, vector<8x256xf32>
    %c0_5 = arith.constant 0 : index
    %c0_6 = arith.constant 0 : index
    %13 = vector.load %arg2[%c0_5, %c0_6] : memref<8x256xf32, #tpu.memory_space<vmem>>, vector<8x256xf32>
    tpu.vector_store %arg2[%c0_5, %c0_6], %12 {strides = array<i32>} : memref<8x256xf32, #tpu.memory_space<vmem>>, vector<8x256xf32>,
    return
  }
  func.func @transform_0(%arg0: i32) -> (i32, i32) {
    %c0_i32 = arith.constant 0 : i32
    %c0_i32_0 = arith.constant 0 : i32
    return %arg0, %c0_i32 : i32, i32
  }
  func.func @transform_1(%arg0: i32) -> (i32, i32) {
    %c0_i32 = arith.constant 0 : i32
    %c0_i32_0 = arith.constant 0 : i32
    return %arg0, %c0_i32 : i32, i32
  }
}

</mosaic_0001>

<bundles_post_ra>
// kernel: tpu_custom_call.1
= control target key start
LH: loop header
LB: loop body
LE: loop exit
PB: predicated region body
PF: predicated region fallthrough
CT: control target
= control target key end

     0   :  { %6 = vsyncpa [#allocation3], 0  ;;  %s118_s0 = inlined_call_operand.hbm [shape: f32[8,256], index: 0, kind: input, shape index: {}]   ;;  %s119_s1 = inlined_call_operand.hbm [shape: f32[8,256], index: 1, kind: output, shape index: {}]  }
   0x1   :  { %7 = vsyncpa [#allocation4], 0  ;;  %s100_s6 = smov [#allocation2]  }
   0x2   :  { %s14_s7 = sshll.u32 %s100_s6, 4  ;;  %s15_s7 = int_to_ptr.vmem [resolvable:$true] %s14_s7 }
   0x3   :  { %s64_s8 = scalar_lea.vmem %s15_s7, 256  ;;  %p69_p1 = scmp.lt.s32.totalorder %s15_s7, %s15_s7 }
   0x4   :  { %p65_p0 = scmp.ne.s32.totalorder %s15_s7, %s64_s8  ;;  %p70_p2 = scmp.lt.s32.totalorder %s64_s8, %s64_s8 }
   0x6   :  { %p71_p3 = por %p70_p2, %p69_p1 }
   0x8   :  { %p72_p4 = pnand %p71_p3, %p65_p0 }
   0xa   :  { %75 = shalt.err (!%p72_p4)
}
   0xb   :  { %17 = dma.hbm_to_vmem [thread:$0]  %s118_s0, 256, %s15_s7, [#allocation3]  }
   0xc   :  { %96 = dma.done.wait [#allocation3], 256  }
   0xd   :  { %97 = vsyncadd [#allocation3], 4294967040  ;;  %v21_v0 = vld [vmem:[#allocation2] sm:$0xff]  ;;  %v22_v1 = vld [vmem:[#allocation2 + $0x8] sm:$0xff]  ;;  %s101_s11 = smov [#allocation5]  }
   0xe   :  { %v23_v2 = vadd.f32 2.0, %v21_v0  ;;  %v24_v3 = vadd.f32 2.0, %v22_v1  ;;  %vm31_vm0 = vcmp.le.f32.partialorder %v21_v0, -2.0  ;;  %vm32_vm1 = vcmp.le.f32.partialorder %v22_v1, -2.0  ;;  %s45_s12 = sshll.u32 %s101_s11, 4  ;;  %s46_s12 = int_to_ptr.vmem [resolvable:$true] %s45_s12 }
   0xf   :  { %vm29_vm2 = vcmp.ge.f32.partialorder %v21_v0, 2.0  ;;  %vm30_vm3 = vcmp.ge.f32.partialorder %v22_v1, 2.0  ;;  %s76_s0 = scalar_lea.vmem %s46_s12, 256  ;;  %p81_p6 = scmp.lt.s32.totalorder %s46_s12, %s46_s12 }
  0x10   :  { %v25_v4 = vmul.f32 %v23_v2, %v23_v2  ;;  %v26_v5 = vmul.f32 %v24_v3, %v24_v3  ;;  %p77_p5 = scmp.ne.s32.totalorder %s46_s12, %s76_s0  ;;  %p82_p7 = scmp.lt.s32.totalorder %s76_s0, %s76_s0 }
  0x12   :  { %v27_v6 = vmul.f32 0.125, %v25_v4  ;;  %v28_v7 = vmul.f32 0.125, %v26_v5  ;;  %p83_p8 = por %p82_p7, %p81_p6 }
  0x14   :  { %v33_v8 = vsel %vm31_vm0, 0.0, %v27_v6  ;;  %v34_v9 = vsel %vm32_vm1, 0.0, %v28_v7  ;;  %p84_p9 = pnand %p83_p8, %p77_p5 }
  0x15   :  { %v35_v10 = vsel %vm29_vm2, %v21_v0, %v33_v8  ;;  %v36_v11 = vsel %vm30_vm3, %v22_v1, %v34_v9 }
  0x16   :  { %37 = vst [vmem:[#allocation5] sm:$0xff] %v35_v10  ;;  %38 = vst [vmem:[#allocation5 + $0x8] sm:$0xff] %v36_v11 }
  0x17   :  { %87 = shalt.err (!%p84_p9)
}
  0x18   :  { %48 = dma.vmem_to_hbm [thread:$0]  %s46_s12, 256, %s119_s1, [#allocation4]  }
  0x19   :  { %98 = dma.done.wait [#allocation4], 256  }
  0x1a   :  { %99 = vsyncadd [#allocation4], 4294967040 }
  0x1b   :  { %52 = vsyncpa [#allocation3], 1 }
  0x1c   :  { %53 = vsyncpa [#allocation4], 1 }

</bundles_post_ra>
